<compile_context>
chip_gen: v7x
topology: tpu7x:2x2x1
jax: 0.10.0
libtpu: 0.0.40
codegen_flags: <defaults>
</compile_context>

<pallas_src>
import math

import jax
import jax.numpy as jnp
from jax.experimental import pallas as pl
from jax.experimental.pallas import tpu as pltpu


def _round_up(x, m):
    return ((x + m - 1) // m) * m


def _sublane(dtype):
    # Sub-32-bit dtypes pack along sublanes: f32 -> 8, bf16 -> 16, int8 -> 32.
    return 8 * (4 // jnp.dtype(dtype).itemsize)


def _vmem_limit_bytes():
    """Per-generation scoped-VMEM limit: never more than half of physical
    (v7x: 64 MiB per TC), capped at 48 MiB on 128 MiB parts (v5e/v6e)."""
    cap = 64 * 1024 * 1024
    try:
        cap = int(getattr(pltpu.get_tpu_info(), "vmem_capacity_bytes", cap))
    except Exception:
        pass
    return min(cap // 2, 48 * 1024 * 1024)


# ----------------------------------------------------------------------------
# Kernels
# ----------------------------------------------------------------------------
def _make_single_k_kernel(compute_dtype):
    # Whole ft_in resident in one K step: no accumulator, no epilogue copy.
    def kernel(x_ref, w_ref, b_ref, o_ref):
        x = x_ref[...].astype(compute_dtype)      # cast on the MXU side only
        o_ref[...] = (
            jnp.dot(x, w_ref[...], preferred_element_type=jnp.float32)
            + b_ref[...]
        ).astype(o_ref.dtype)

    return kernel


def _make_multi_k_kernel(*, tk, ft_in, compute_dtype, w_resident, acc_in_out):
    mask_tail = (ft_in % tk) != 0  # last K block reads undefined columns

    def partial_dot(x_ref, w_ref):
        k = pl.program_id(1)
        x = x_ref[...]
        if mask_tail:
            # Zero the OOB K tail (undefined HBM reads could be NaN/Inf).
            col = jax.lax.broadcasted_iota(jnp.int32, x.shape, 1) + k * tk
            x = jnp.where(col < ft_in, x, jnp.zeros_like(x))
        x = x.astype(compute_dtype)
        if w_resident:
            w = w_ref[pl.ds(pl.multiple_of(k * tk, tk), tk), :]
        else:
            w = w_ref[...]
        return jnp.dot(x, w, preferred_element_type=jnp.float32)

    if acc_in_out:
        # f32 output: accumulate directly into o_ref (its block index is
        # constant over k, so it stays VMEM-resident across the reduction).
        def kernel(x_ref, w_ref, b_ref, o_ref):
            k = pl.program_id(1)
            p = partial_dot(x_ref, w_ref)

            @pl.when(k == 0)
            def _():
                o_ref[...] = p + b_ref[...]

            @pl.when(k != 0)
            def _():
                o_ref[...] += p

        return kernel, False

    # Non-f32 output: keep an f32 scratch accumulator.
    def kernel(x_ref, w_ref, b_ref, o_ref, acc_ref):
        k = pl.program_id(1)
        p = partial_dot(x_ref, w_ref)

        @pl.when(k == 0)
        def _():
            acc_ref[...] = p + b_ref[...]

        @pl.when(k != 0)
        def _():
            acc_ref[...] += p

        @pl.when(k == pl.num_programs(1) - 1)
        def _():
            o_ref[...] = acc_ref[...].astype(o_ref.dtype)

    return kernel, True


# ----------------------------------------------------------------------------
# Wrapper
# ----------------------------------------------------------------------------
def logreg_forward(
    seq,
    weight,
    bias,
    *,
    compute_dtype=None,   # e.g. jnp.bfloat16: cast to MXU dtype inside kernel
    tk_max=2048,          # keep full ft_in resident (single K step) if <= this
    tk_multi=512,         # K tile width in the multi-K regime
    tm_max=1024,          # row-tile cap (biggest that fits VMEM wins)
    trim=True,            # slice off class-dim padding (skipped if none added)
):
    """seq: (N, ft_in), weight: (nb_classes, ft_in), bias: (nb_classes,)."""
    n, ft_in = seq.shape
    nb_classes = weight.shape[0]
    out_dtype = seq.dtype
    compute_dtype = jnp.dtype(compute_dtype if compute_dtype is not None else seq.dtype)

    # Lane-dense output / W columns: pad class dim to a multiple of 128.
    nbp = _round_up(max(nb_classes, 1), 128)

    # K tiling: single step when ft_in is small (the common GCL/GRACE shape).
    if ft_in <= tk_max:
        nk, tk, k_pad = 1, ft_in, ft_in
    else:
        tk = tk_multi
        k_pad = _round_up(ft_in, tk)
        nk = k_pad // tk

    # Only the SMALL operands are padded/cast in the wrapper (seq is untouched).
    w_t = jnp.zeros((k_pad, nbp), dtype=compute_dtype)
    w_t = w_t.at[:ft_in, :nb_classes].set(weight.T.astype(compute_dtype))
    b2d = jnp.zeros((1, nbp), dtype=jnp.float32)
    b2d = b2d.at[:, :nb_classes].set(bias.astype(jnp.float32))

    seq_item = jnp.dtype(seq.dtype).itemsize
    w_item = compute_dtype.itemsize
    out_item = jnp.dtype(out_dtype).itemsize
    sub = _sublane(seq.dtype)

    # Multi-K regime: keep W^T fully VMEM-resident if it fits a few MiB.
    w_resident = (nk == 1) or (k_pad * nbp * w_item <= 8 * 1024 * 1024)
    acc_in_out = jnp.dtype(out_dtype) == jnp.dtype(jnp.float32)
    use_scratch = (nk > 1) and (not acc_in_out)

    vmem_limit = _vmem_limit_bytes()
    budget = vmem_limit - 4 * 1024 * 1024       # headroom for Mosaic scratch
    w_vmem = (k_pad if w_resident else tk) * nbp * w_item

    def vmem_est(tm_):
        b = 2 * tm_ * tk * seq_item             # seq tiles, double-buffered
        b += 2 * w_vmem                         # W^T (2 bufs allocated)
        b += 2 * tm_ * nbp * out_item           # output tiles
        b += 2 * nbp * 4                        # bias
        if use_scratch:
            b += tm_ * nbp * 4                  # f32 accumulator
        return b

    tm = min(tm_max, _round_up(n, sub))
    while tm > sub and vmem_est(tm) > budget:
        tm = max(sub, _round_up(tm // 2, sub))

    # v7x megacore: keep >= 2 row tiles on the "parallel" axis when possible.
    if n > sub and pl.cdiv(n, tm) < 2:
        tm = min(tm, max(sub, _round_up(pl.cdiv(n, 2), sub)))

    rows = pl.cdiv(n, tm)   # ragged last row tile: OOB output rows are dropped

    if nk == 1:
        kernel = _make_single_k_kernel(compute_dtype)
        grid = (rows,)
        in_specs = [
            pl.BlockSpec((tm, ft_in), lambda i: (i, 0)),     # seq: streamed
            pl.BlockSpec((ft_in, nbp), lambda i: (0, 0)),    # W^T: resident
            pl.BlockSpec((1, nbp), lambda i: (0, 0)),        # bias: resident
        ]
        out_specs = pl.BlockSpec((tm, nbp), lambda i: (i, 0))
        scratch_shapes = []
        dim_sem = ("parallel",)
    else:
        kernel, needs_scratch = _make_multi_k_kernel(
            tk=tk, ft_in=ft_in, compute_dtype=compute_dtype,
            w_resident=w_resident, acc_in_out=acc_in_out)
        grid = (rows, nk)
        if w_resident:
            w_spec = pl.BlockSpec((k_pad, nbp), lambda i, k: (0, 0))
        else:
            w_spec = pl.BlockSpec((tk, nbp), lambda i, k: (k, 0))
        in_specs = [
            pl.BlockSpec((tm, tk), lambda i, k: (i, k)),     # seq: streamed
            w_spec,
            pl.BlockSpec((1, nbp), lambda i, k: (0, 0)),
        ]
        out_specs = pl.BlockSpec((tm, nbp), lambda i, k: (i, 0))
        scratch_shapes = (
            [pltpu.VMEM((tm, nbp), jnp.float32)] if needs_scratch else []
        )
        dim_sem = ("parallel", "arbitrary")

    out = pl.pallas_call(
        kernel,
        out_shape=jax.ShapeDtypeStruct((n, nbp), out_dtype),
        grid_spec=pltpu.PrefetchScalarGridSpec(
            num_scalar_prefetch=0,
            grid=grid,
            in_specs=in_specs,
            out_specs=out_specs,
            scratch_shapes=scratch_shapes,
        ),
        compiler_params=pltpu.CompilerParams(
            dimension_semantics=dim_sem,
            vmem_limit_bytes=int(vmem_limit),
        ),
    )(seq, w_t, b2d)

    # No row padding was added, so only the class dim may need trimming.
    if trim and nbp != nb_classes:
        out = out[:, :nb_classes]
    return out


def init_logreg_params(key, ft_in, nb_classes):
    # xavier_uniform_: U(-a, a) with a = sqrt(6 / (fan_in + fan_out))
    a = math.sqrt(6.0 / (ft_in + nb_classes))
    weight = jax.random.uniform(
        key, (nb_classes, ft_in), dtype=jnp.float32, minval=-a, maxval=a
    )
    bias = jnp.zeros((nb_classes,), dtype=jnp.float32)  # bias.data.fill_(0.0)
    return weight, bias


if __name__ == "__main__":
    key = jax.random.PRNGKey(0)
    k_w, k_x, k_w2, k_x2 = jax.random.split(key, 4)

    # --- small shapes matching the module: seq=(8, 32), nb_classes=16 -------
    N, FT_IN, NB_CLASSES = 8, 32, 16
    weight, bias = init_logreg_params(k_w, FT_IN, NB_CLASSES)
    seq = jax.random.normal(k_x, (N, FT_IN), dtype=jnp.float32)
    ref = seq @ weight.T + bias

    # f32 path: exact semantics of the PyTorch module (single-K, no scratch).
    out = jax.block_until_ready(logreg_forward(seq, weight, bias))
    assert out.shape == (N, NB_CLASSES)
    assert jnp.allclose(out, ref, atol=1e-5, rtol=1e-5)

    # bf16 MXU path: cast happens INSIDE the kernel (no extra HBM pass).
    out_bf16 = jax.block_until_ready(
        logreg_forward(seq, weight, bias, compute_dtype=jnp.bfloat16)
    )
    assert out_bf16.shape == (N, NB_CLASSES)
    assert jnp.allclose(out_bf16, ref, atol=1e-1, rtol=1e-1)

    # Multi-K / ragged-rows path (exercises in-kernel K-tail mask, resident W^T,
    # accumulate-into-output, and dropped OOB row writes).
    N2, FT2 = 20, 1152   # 1152 % 512 != 0, 20 % tm != 0
    weight2, bias2 = init_logreg_params(k_w2, FT2, NB_CLASSES)
    seq2 = jax.random.normal(k_x2, (N2, FT2), dtype=jnp.float32)
    ref2 = seq2 @ weight2.T + bias2
    out2 = jax.block_until_ready(
        logreg_forward(seq2, weight2, bias2, tk_max=512)
    )
    assert out2.shape == (N2, NB_CLASSES)
    assert jnp.allclose(out2, ref2, atol=1e-2, rtol=1e-2)

    print("KERNEL_OK")
</pallas_src>

<mosaic_0001>
module attributes {stable_mosaic.version = 11 : i64} {
  func.func @kernel(%arg0: i32, %arg1: memref<8x32xf32, #tpu.memory_space<vmem>>, %arg2: memref<32x128xf32, #tpu.memory_space<vmem>>, %arg3: memref<1x128xf32, #tpu.memory_space<vmem>>, %arg4: memref<8x128xf32, #tpu.memory_space<vmem>>) attributes {dimension_semantics = [#tpu.dimension_semantics<parallel>], iteration_bounds = array<i64: 1>, scalar_prefetch = 0 : i64, scratch_operands = 0 : i64, tpu.core_type = #tpu.core_type<tc>, window_params = [{transform_indices = @transform_0, window_bounds = array<i64: 8, 32>}, {pipeline_mode = #tpu.pipeline_mode<synchronous>, transform_indices = @transform_1, window_bounds = array<i64: 32, 128>}, {pipeline_mode = #tpu.pipeline_mode<synchronous>, transform_indices = @transform_2, window_bounds = array<i64: 1, 128>}, {transform_indices = @transform_3, window_bounds = array<i64: 8, 128>}]} {
    %c0 = arith.constant 0 : index
    %c0_0 = arith.constant 0 : index
    %0 = vector.load %arg1[%c0, %c0_0] : memref<8x32xf32, #tpu.memory_space<vmem>>, vector<8x32xf32>
    %c0_1 = arith.constant 0 : index
    %c0_2 = arith.constant 0 : index
    %1 = vector.load %arg2[%c0_1, %c0_2] : memref<32x128xf32, #tpu.memory_space<vmem>>, vector<32x128xf32>
    %cst = arith.constant dense<0.000000e+00> : vector<8x128xf32>
    %2 = tpu.matmul %0, %1, %cst {dimension_numbers = #tpu.dot_dimension_numbers<[1], [0], [0], [1], [0, 0, 1, 1], [], []>} : vector<8x32xf32>, vector<32x128xf32>, vector<8x128xf32> -> vector<8x128xf32>
    %c0_3 = arith.constant 0 : index
    %c0_4 = arith.constant 0 : index
    %3 = vector.load %arg3[%c0_3, %c0_4] : memref<1x128xf32, #tpu.memory_space<vmem>>, vector<1x128xf32>
    %4 = vector.broadcast %3 : vector<1x128xf32> to vector<8x128xf32>
    %5 = arith.addf %2, %4 : vector<8x128xf32>
    %c0_5 = arith.constant 0 : index
    %c0_6 = arith.constant 0 : index
    %6 = vector.load %arg4[%c0_5, %c0_6] : memref<8x128xf32, #tpu.memory_space<vmem>>, vector<8x128xf32>
    tpu.vector_store %arg4[%c0_5, %c0_6], %5 {strides = array<i32>} : memref<8x128xf32, #tpu.memory_space<vmem>>, vector<8x128xf32>,
    return
  }
  func.func @transform_0(%arg0: i32) -> (i32, i32) {
    %c0_i32 = arith.constant 0 : i32
    %c0_i32_0 = arith.constant 0 : i32
    return %arg0, %c0_i32 : i32, i32
  }
  func.func @transform_1(%arg0: i32) -> (i32, i32) {
    %c0_i32 = arith.constant 0 : i32
    %c0_i32_0 = arith.constant 0 : i32
    %c0_i32_1 = arith.constant 0 : i32
    return %c0_i32, %c0_i32_0 : i32, i32
  }
  func.func @transform_2(%arg0: i32) -> (i32, i32) {
    %c0_i32 = arith.constant 0 : i32
    %c0_i32_0 = arith.constant 0 : i32
    %c0_i32_1 = arith.constant 0 : i32
    return %c0_i32, %c0_i32_0 : i32, i32
  }
  func.func @transform_3(%arg0: i32) -> (i32, i32) {
    %c0_i32 = arith.constant 0 : i32
    %c0_i32_0 = arith.constant 0 : i32
    return %arg0, %c0_i32 : i32, i32
  }
}

</mosaic_0001>

<bundles_post_ra>
// kernel: tpu_custom_call.1
= control target key start
LH: loop header
LB: loop body
LE: loop exit
PB: predicated region body
PF: predicated region fallthrough
CT: control target
= control target key end

     0   :  { %8 = vsyncpa [#allocation3], 0  ;;  %s322_s0 = inlined_call_operand.hbm [shape: f32[8,32], index: 0, kind: input, shape index: {}]   ;;  %s323_s1 = inlined_call_operand.hbm [shape: f32[32,128], index: 1, kind: input, shape index: {}]   ;;  %s324_s2 = inlined_call_operand.vmem [shape: f32[1,128], index: 2, kind: input, shape index: {}]   ;;  %s325_s3 = inlined_call_operand.hbm [shape: f32[8,128], index: 3, kind: output, shape index: {}]  }
   0x1   :  { %9 = vsyncpa [#allocation6], 0 }
   0x2   :  { %10 = vsyncpa [#allocation4], 0  ;;  %s248_s12 = smov [#allocation2]   ;;  %s249_s14 = smov [#allocation5]  }
   0x3   :  { %s17_s13 = sshll.u32 %s248_s12, 4  ;;  %s26_s15 = sshll.u32 %s249_s14, 4  ;;  %s18_s13 = int_to_ptr.vmem [resolvable:$true] %s17_s13  ;;  %s276_s15 = int_to_ptr.vmem [resolvable:$true] %s26_s15 }
   0x4   :  { %s176_s18 = scalar_lea.hbm %s322_s0, 128 }
   0x5   :  { %p177_p0 = scmp.ne.s32.totalorder %s322_s0, %s176_s18  ;;  %p180_p1 = scmp.lt.u32.totalorder %s176_s18, %s322_s0 }
   0x7   :  { %p182_p2 = pnand %p180_p1, %p177_p0 }
   0x9   :  { %185 = shalt.err (!%p182_p2)
}
   0xa   :  { %s186_s23 = scalar_lea.vmem %s18_s13, 128  ;;  %p191_p4 = scmp.lt.s32.totalorder %s18_s13, %s18_s13 }
   0xb   :  { %p187_p3 = scmp.ne.s32.totalorder %s18_s13, %s186_s23  ;;  %p192_p5 = scmp.lt.s32.totalorder %s186_s23, %s186_s23 }
   0xd   :  { %p193_p6 = por %p192_p5, %p191_p4 }
   0xf   :  { %p194_p7 = pnand %p193_p6, %p187_p3 }
  0x11   :  { %197 = shalt.err (!%p194_p7)
}
  0x12   :  { %20 = dma.hbm_to_vmem [thread:$0]  %s322_s0, 128, %s18_s13, [#allocation3]  }
  0x13   :  { %s198_s28 = scalar_lea.hbm %s323_s1, 512 }
  0x14   :  { %p199_p8 = scmp.ne.s32.totalorder %s323_s1, %s198_s28  ;;  %p202_p9 = scmp.lt.u32.totalorder %s198_s28, %s323_s1 }
  0x16   :  { %p204_p10 = pnand %p202_p9, %p199_p8 }
  0x18   :  { %207 = shalt.err (!%p204_p10)
}
  0x19   :  { %s208_s6 = scalar_lea.vmem %s276_s15, 512  ;;  %p213_p12 = scmp.lt.s32.totalorder %s276_s15, %s276_s15 }
  0x1a   :  { %p209_p11 = scmp.ne.s32.totalorder %s276_s15, %s208_s6  ;;  %p214_p13 = scmp.lt.s32.totalorder %s208_s6, %s208_s6 }
  0x1c   :  { %p215_p0 = por %p214_p13, %p213_p12 }
  0x1e   :  { %p216_p1 = pnand %p215_p0, %p209_p11 }
  0x20   :  { %219 = shalt.err (!%p216_p1)
}
  0x21   :  { %s250_s0 = smov 128   ;;  %s251_s7 = smov 8  }
  0x22   :  { %32 = dma.hbm_to_vmem [thread:$0]  %s323_s1, 512, %s276_s15, [#allocation6], %s250_s0, %s250_s0, %s251_s7  }
  0x23   :  { %242 = dma.done.wait [#allocation3], 128  }
  0x24   :  { %243 = vsyncadd [#allocation3], 4294967168 }
  0x25   :  { %244 = dma.done.wait [#allocation6], 512  }
  0x26   :  { %245 = vsyncadd [#allocation6], 4294966784  ;;  %v252_v0 = vmov 0.0|0.0   ;;  %vm253_vm0 = vmmov 0   ;;  %v254_v1 = vmov 0.0   ;;  %v42_v2 = vld [vmem:[#allocation5] sm:$0xff] }
  0x27   :  { %162 = vmatprep.subr.bf16.mxu0 %v252_v0  ;;  %159 = vmatprep.mubr.msk.f32.mxu0 %vm253_vm0, %v254_v1  ;;  %v43_v3 = vld [vmem:[#allocation5 + $0x8] sm:$0xff]  ;;  %v44_v4 = vld [vmem:[#allocation5 + $0x10] sm:$0xff]  ;;  %v45_v6 = vld [vmem:[#allocation5 + $0x18] sm:$0xff]  ;;  %vm53_vm1 = vcmask 261120   ;;  %s255_s11 = smov [#allocation7]  }
  0x28   :  { %v163_v5 = vpack.c.bf16 %v43_v3, %v42_v2  ;;  %v166_v7 = vpack.c.bf16 %v45_v6, %v44_v4  ;;  %v41_v8 = vld [vmem:[#allocation2] sm:$0xff]  ;;  %s134_s12 = sshll.u32 %s255_s11, 4  ;;  %s135_s12 = int_to_ptr.vmem [resolvable:$true] %s134_s12 }
  0x29   :  { %v144_v9 = vld [vmem:[%s324_s2] ss:$0 sm:$0xff]  ;;  %s220_s13 = scalar_lea.vmem %s135_s12, 128  ;;  %p225_p3 = scmp.lt.s32.totalorder %s135_s12, %s135_s12 }
  0x2a   :  { %164 = vmatpush3.bf16.msra.mxu0 %v163_v5  ;;  %p221_p2 = scmp.ne.s32.totalorder %s135_s12, %s220_s13  ;;  %p226_p4 = scmp.lt.s32.totalorder %s220_s13, %s220_s13 }
  0x2b   :  { %165 = vmatprep.subr.bf16.mxu0 %v252_v0 }
  0x2c   :  { %p227_p5 = por %p226_p4, %p225_p3 }
  0x2e   :  { %167 = vmatpush3.bf16.msra.mxu0 %v166_v7  ;;  %p228_p6 = pnand %p227_p5, %p221_p2 }
  0x31   :  { %160 = vmatmul.mubr.msk.f32.vlgmr.msra.gmra.mrb[0].mxu0 %vm53_vm1, %v41_v8 }
 0x104   :  { %v123_v10 = vpop.f32.mrb[0].mxu0 }
 0x105   :  { %v124_v11 = vadd.f32 %v144_v9, %v123_v10  ;;  %v161_v12 = vpop.f32.mrb[1].mxu0 }
 0x107   :  { %127 = vst [vmem:[#allocation7] sm:$0xff] %v124_v11 }
 0x108   :  { %231 = shalt.err (!%p228_p6)
}
 0x109   :  { %s232_s16 = scalar_lea.hbm %s325_s3, 128 }
 0x10a   :  { %p233_p7 = scmp.ne.s32.totalorder %s325_s3, %s232_s16  ;;  %p236_p8 = scmp.lt.u32.totalorder %s232_s16, %s325_s3 }
 0x10c   :  { %p238_p9 = pnand %p236_p8, %p233_p7 }
 0x10e   :  { %241 = shalt.err (!%p238_p9)
}
 0x10f   :  { %137 = dma.vmem_to_hbm [thread:$0]  %s135_s12, 128, %s325_s3, [#allocation4]  }
 0x110   :  { %246 = dma.done.wait [#allocation4], 128  }
 0x111   :  { %247 = vsyncadd [#allocation4], 4294967168 }
 0x112   :  { %141 = vsyncpa [#allocation3], 1 }
 0x113   :  { %142 = vsyncpa [#allocation6], 1 }
 0x114   :  { %143 = vsyncpa [#allocation4], 1 }

</bundles_post_ra>
